<compile_context>
chip_gen: v6e
topology: v6e:2x2x1
jax: 0.10.0
libtpu: 0.0.40
codegen_flags: <defaults>
</compile_context>

<pallas_src>
import functools
import inspect

import jax
import jax.numpy as jnp
from jax.experimental import pallas as pl
from jax.experimental.pallas import tpu as pltpu

LANE = 128      # lane width (last-dim alignment)
SUBLANE = 8     # f32 sublane alignment (second-to-last dim)

_HAS_PIPELINE_MODE = (
    hasattr(pl, "Buffered")
    and "pipeline_mode" in inspect.signature(pl.BlockSpec).parameters
)


def _round_up(x: int, m: int) -> int:
    return ((x + m - 1) // m) * m


def _vmem_budget_bytes() -> int:
    """~85% of physical VMEM: leaves headroom for compiler scratch/semaphores.

    v7x: 64 MiB -> ~54 MiB budget; v5e/v6e: 128 MiB -> ~108 MiB budget.
    """
    cap = 128 * 1024 * 1024
    try:
        cap = int(getattr(pltpu.get_tpu_info(), "vmem_capacity_bytes", cap))
    except Exception:
        pass
    return int(cap * 0.85)


def _resident_spec(shape):
    """Full-block operand with constant index_map -> stays VMEM-resident.

    Buffered(1): no point double-buffering a block whose index never changes.
    """
    if _HAS_PIPELINE_MODE:
        return pl.BlockSpec(shape, lambda i: (0, 0), pipeline_mode=pl.Buffered(1))
    return pl.BlockSpec(shape, lambda i: (0, 0))


def _mlp_kernel(*refs, n_layers: int):
    """refs = (x, w_0..w_{L-1}, b_0..b_{L-1}, out)."""
    x_ref = refs[0]
    w_refs = refs[1:1 + n_layers]
    b_refs = refs[1 + n_layers:1 + 2 * n_layers]
    o_ref = refs[1 + 2 * n_layers]

    h = x_ref[...]                                     # f32 [tm, in_p]
    for i in range(n_layers):
        w = w_refs[i][...]
        # Matmul operands in the weights' dtype (bf16 -> full MXU rate on
        # v6e/v7x); f32 MXU accumulation. Bias add + ReLU stay f32 on the VPU
        # (v5e has no bf16 VPU path anyway).
        acc = jnp.dot(h.astype(w.dtype), w, preferred_element_type=jnp.float32)
        acc = acc + b_refs[i][...]                     # [1, out_f_p] broadcast
        if i < n_layers - 1:
            acc = jnp.maximum(acc, 0.0)                # ReLU between layers
        h = acc
    o_ref[...] = h.astype(o_ref.dtype)


def mlp_forward_pallas(x, padded_params, out_dim, *, row_tile=512):
    """Fused MLP forward. x:[N, in_dim]; padded_params: [(W_t_pad, b_pad), ...]."""
    n, in_dim = x.shape
    n_layers = len(padded_params)
    in_p = padded_params[0][0].shape[0]
    out_p = padded_params[-1][0].shape[1]

    # ---- VMEM budget check for the weights-resident design -----------------
    budget = _vmem_budget_bytes()
    weight_bytes = sum(w.size * w.dtype.itemsize + b.size * b.dtype.itemsize
                       for w, b in padded_params)
    resident = weight_bytes * (1 if _HAS_PIPELINE_MODE else 2)
    if resident > budget:
        # TODO(synk): weight-streaming fallback (second grid axis / emit_pipeline
        # over out-feature column panels) for hidden sizes whose padded weights
        # exceed the per-core VMEM budget.
        raise NotImplementedError(
            f"resident weights ({resident / 2**20:.1f} MiB) exceed the VMEM "
            f"budget ({budget / 2**20:.1f} MiB); weight streaming not implemented")

    # ---- Row tile selection --------------------------------------------------
    # Big tiles (>=512) amortize per-grid-step overhead and fill the MXU M dim;
    # keep at least 2 grid steps when possible (v7x megacore), multiple of 8;
    # shrink until the pipelined x/out tiles + live intermediates fit VMEM.
    tm = min(row_tile, _round_up(n, SUBLANE))
    if pl.cdiv(n, tm) < 2 and tm > SUBLANE:
        tm = _round_up(pl.cdiv(n, 2), SUBLANE)

    max_feat = max(max(w.shape) for w, _ in padded_params)

    def _tile_bytes(t):
        io = 2 * t * in_p * 4 + 2 * t * out_p * 4   # double-buffered x / out tiles
        act = 2 * t * max_feat * 4                  # live f32 intermediates
        return io + act

    while tm > SUBLANE and resident + _tile_bytes(tm) > budget:
        tm = max(SUBLANE, _round_up(tm // 2, SUBLANE))

    grid = (pl.cdiv(n, tm),)

    # ---- Input: pad feature columns only (zeros keep the math exact). The row
    # remainder is handled by the grid's partial last block; its garbage rows
    # only influence output rows that the masked final store never writes.
    x_in = x if in_dim == in_p else jnp.pad(x, ((0, 0), (0, in_p - in_dim)))

    in_specs = [pl.BlockSpec((tm, in_p), lambda i: (i, 0))]
    for w, _ in padded_params:
        in_specs.append(_resident_spec(w.shape))
    for _, b in padded_params:
        in_specs.append(_resident_spec(b.shape))

    flops = 2 * n * sum(w.shape[0] * w.shape[1] for w, _ in padded_params)
    bytes_accessed = (x_in.size * x_in.dtype.itemsize
                      + weight_bytes
                      + n * out_p * x.dtype.itemsize)

    out = pl.pallas_call(
        functools.partial(_mlp_kernel, n_layers=n_layers),
        out_shape=jax.ShapeDtypeStruct((n, out_p), x.dtype),
        grid_spec=pltpu.PrefetchScalarGridSpec(
            num_scalar_prefetch=0,
            grid=grid,
            in_specs=in_specs,
            out_specs=pl.BlockSpec((tm, out_p), lambda i: (i, 0)),
        ),
        compiler_params=pltpu.CompilerParams(
            # Row tiles are independent -> shard across TensorCores on v7x.
            dimension_semantics=("parallel",),
            vmem_limit_bytes=budget,
        ),
        cost_estimate=pl.CostEstimate(
            flops=flops, transcendentals=0, bytes_accessed=bytes_accessed),
    )(x_in, *[w for w, _ in padded_params], *[b for _, b in padded_params])

    return out[:, :out_dim]


class MLP:
    """JAX/Pallas port of the PyTorch MLP module (nonlin fixed to ReLU)."""

    def __init__(self, in_dim, hid_dim, out_dim, n_layers, key,
                 compute_dtype=jnp.bfloat16):
        self.n_layers = n_layers
        self.out_dim = out_dim
        self.compute_dtype = compute_dtype

        dims = []
        if n_layers > 1:
            dims.append((in_dim, hid_dim))
            for _ in range(n_layers - 2):
                dims.append((hid_dim, hid_dim))
            dims.append((hid_dim, out_dim))
        else:
            dims.append((in_dim, out_dim))

        # Unpadded f32 params (PyTorch-style uniform init), pre-transposed to
        # [in_f, out_f]; used by the pure-JAX reference check.
        self.params = []
        for fan_in, fan_out in dims:
            key, kw, kb = jax.random.split(key, 3)
            bound = 1.0 / jnp.sqrt(fan_in)
            w_t = jax.random.uniform(
                kw, (fan_in, fan_out), jnp.float32, -bound, bound)
            b = jax.random.uniform(kb, (fan_out,), jnp.float32, -bound, bound)
            self.params.append((w_t, b))

        # Padded copies for the kernel: feature dims rounded up to 128 (zero
        # fill -> exact math), weights in compute_dtype (bf16 => full MXU rate
        # and half the resident VMEM), bias kept f32 as [1, out_f_p].
        # Note: padding to 256 would fill the v6e/v7x MXU better for narrow
        # layers; 128 keeps v5e-friendly lane density and is exact either way.
        self.padded_params = []
        for w_t, b in self.params:
            fi, fo = w_t.shape
            fi_p, fo_p = _round_up(fi, LANE), _round_up(fo, LANE)
            w_p = (jnp.zeros((fi_p, fo_p), jnp.float32)
                   .at[:fi, :fo].set(w_t).astype(compute_dtype))
            b_p = jnp.zeros((1, fo_p), jnp.float32).at[0, :fo].set(b)
            self.padded_params.append((w_p, b_p))

    def __call__(self, graph, x):
        # `graph` is unused in the reference forward pass as well.
        return mlp_forward_pallas(x, self.padded_params, self.out_dim)


if __name__ == "__main__":
    key = jax.random.PRNGKey(0)
    key, kx, kp = jax.random.split(key, 3)

    in_dim, hid_dim, out_dim, n_layers = 16, 32, 8, 3
    n_rows = 8  # e.g. number of graph nodes

    x = jax.random.normal(kx, (n_rows, in_dim), jnp.float32)
    model = MLP(in_dim, hid_dim, out_dim, n_layers, kp)

    y = model(None, x)
    jax.block_until_ready(y)

    # Pure-JAX reference with the same unpadded params and the same numerics
    # as the kernel (bf16 matmul operands, f32 accumulation / bias / ReLU).
    ref = x
    for i, (w_t, b) in enumerate(model.params):
        ref = jnp.dot(ref.astype(model.compute_dtype),
                      w_t.astype(model.compute_dtype),
                      preferred_element_type=jnp.float32) + b
        if i < n_layers - 1:
            ref = jnp.maximum(ref, 0.0)

    assert y.shape == (n_rows, out_dim)
    assert jnp.allclose(y, ref, atol=1e-4, rtol=1e-4), float(
        jnp.max(jnp.abs(y - ref)))

    print("KERNEL_OK")
</pallas_src>

<mosaic_0001>
module attributes {stable_mosaic.version = 11 : i64} {
  func.func @_mlp_kernel(%arg0: i32, %arg1: memref<8x128xf32, #tpu.memory_space<vmem>>, %arg2: memref<128x128xbf16, #tpu.memory_space<vmem>>, %arg3: memref<128x128xbf16, #tpu.memory_space<vmem>>, %arg4: memref<128x128xbf16, #tpu.memory_space<vmem>>, %arg5: memref<1x128xf32, #tpu.memory_space<vmem>>, %arg6: memref<1x128xf32, #tpu.memory_space<vmem>>, %arg7: memref<1x128xf32, #tpu.memory_space<vmem>>, %arg8: memref<8x128xf32, #tpu.memory_space<vmem>>) attributes {dimension_semantics = [#tpu.dimension_semantics<parallel>], iteration_bounds = array<i64: 1>, scalar_prefetch = 0 : i64, scratch_operands = 0 : i64, tpu.core_type = #tpu.core_type<tc>, window_params = [{transform_indices = @transform_0, window_bounds = array<i64: 8, 128>}, {pipeline_mode = #tpu.pipeline_mode<synchronous>, transform_indices = @transform_1, window_bounds = array<i64: 128, 128>}, {pipeline_mode = #tpu.pipeline_mode<synchronous>, transform_indices = @transform_2, window_bounds = array<i64: 128, 128>}, {pipeline_mode = #tpu.pipeline_mode<synchronous>, transform_indices = @transform_3, window_bounds = array<i64: 128, 128>}, {pipeline_mode = #tpu.pipeline_mode<synchronous>, transform_indices = @transform_4, window_bounds = array<i64: 1, 128>}, {pipeline_mode = #tpu.pipeline_mode<synchronous>, transform_indices = @transform_5, window_bounds = array<i64: 1, 128>}, {pipeline_mode = #tpu.pipeline_mode<synchronous>, transform_indices = @transform_6, window_bounds = array<i64: 1, 128>}, {transform_indices = @transform_7, window_bounds = array<i64: 8, 128>}]} {
    %c0 = arith.constant 0 : index
    %c0_0 = arith.constant 0 : index
    %0 = vector.load %arg1[%c0, %c0_0] : memref<8x128xf32, #tpu.memory_space<vmem>>, vector<8x128xf32>
    %c0_1 = arith.constant 0 : index
    %c0_2 = arith.constant 0 : index
    %1 = vector.load %arg2[%c0_1, %c0_2] : memref<128x128xbf16, #tpu.memory_space<vmem>>, vector<128x128xbf16>
    %2 = arith.truncf %0 : vector<8x128xf32> to vector<8x128xbf16>
    %cst = arith.constant dense<0.000000e+00> : vector<8x128xf32>
    %3 = tpu.matmul %2, %1, %cst {dimension_numbers = #tpu.dot_dimension_numbers<[1], [0], [0], [1], [0, 0, 1, 1], [], []>} : vector<8x128xbf16>, vector<128x128xbf16>, vector<8x128xf32> -> vector<8x128xf32>
    %c0_3 = arith.constant 0 : index
    %c0_4 = arith.constant 0 : index
    %4 = vector.load %arg5[%c0_3, %c0_4] : memref<1x128xf32, #tpu.memory_space<vmem>>, vector<1x128xf32>
    %5 = vector.broadcast %4 : vector<1x128xf32> to vector<8x128xf32>
    %6 = arith.addf %3, %5 : vector<8x128xf32>
    %cst_5 = arith.constant 0.000000e+00 : f32
    %7 = vector.broadcast %cst_5 : f32 to vector<8x128xf32>
    %8 = arith.maximumf %6, %7 : vector<8x128xf32>
    %c0_6 = arith.constant 0 : index
    %c0_7 = arith.constant 0 : index
    %9 = vector.load %arg3[%c0_6, %c0_7] : memref<128x128xbf16, #tpu.memory_space<vmem>>, vector<128x128xbf16>
    %10 = arith.truncf %8 : vector<8x128xf32> to vector<8x128xbf16>
    %cst_8 = arith.constant dense<0.000000e+00> : vector<8x128xf32>
    %11 = tpu.matmul %10, %9, %cst_8 {dimension_numbers = #tpu.dot_dimension_numbers<[1], [0], [0], [1], [0, 0, 1, 1], [], []>} : vector<8x128xbf16>, vector<128x128xbf16>, vector<8x128xf32> -> vector<8x128xf32>
    %c0_9 = arith.constant 0 : index
    %c0_10 = arith.constant 0 : index
    %12 = vector.load %arg6[%c0_9, %c0_10] : memref<1x128xf32, #tpu.memory_space<vmem>>, vector<1x128xf32>
    %13 = vector.broadcast %12 : vector<1x128xf32> to vector<8x128xf32>
    %14 = arith.addf %11, %13 : vector<8x128xf32>
    %cst_11 = arith.constant 0.000000e+00 : f32
    %15 = vector.broadcast %cst_11 : f32 to vector<8x128xf32>
    %16 = arith.maximumf %14, %15 : vector<8x128xf32>
    %c0_12 = arith.constant 0 : index
    %c0_13 = arith.constant 0 : index
    %17 = vector.load %arg4[%c0_12, %c0_13] : memref<128x128xbf16, #tpu.memory_space<vmem>>, vector<128x128xbf16>
    %18 = arith.truncf %16 : vector<8x128xf32> to vector<8x128xbf16>
    %cst_14 = arith.constant dense<0.000000e+00> : vector<8x128xf32>
    %19 = tpu.matmul %18, %17, %cst_14 {dimension_numbers = #tpu.dot_dimension_numbers<[1], [0], [0], [1], [0, 0, 1, 1], [], []>} : vector<8x128xbf16>, vector<128x128xbf16>, vector<8x128xf32> -> vector<8x128xf32>
    %c0_15 = arith.constant 0 : index
    %c0_16 = arith.constant 0 : index
    %20 = vector.load %arg7[%c0_15, %c0_16] : memref<1x128xf32, #tpu.memory_space<vmem>>, vector<1x128xf32>
    %21 = vector.broadcast %20 : vector<1x128xf32> to vector<8x128xf32>
    %22 = arith.addf %19, %21 : vector<8x128xf32>
    %c0_17 = arith.constant 0 : index
    %c0_18 = arith.constant 0 : index
    %23 = vector.load %arg8[%c0_17, %c0_18] : memref<8x128xf32, #tpu.memory_space<vmem>>, vector<8x128xf32>
    tpu.vector_store %arg8[%c0_17, %c0_18], %22 {strides = array<i32>} : memref<8x128xf32, #tpu.memory_space<vmem>>, vector<8x128xf32>,
    return
  }
  func.func @transform_0(%arg0: i32) -> (i32, i32) {
    %c0_i32 = arith.constant 0 : i32
    %c0_i32_0 = arith.constant 0 : i32
    return %arg0, %c0_i32 : i32, i32
  }
  func.func @transform_1(%arg0: i32) -> (i32, i32) {
    %c0_i32 = arith.constant 0 : i32
    %c0_i32_0 = arith.constant 0 : i32
    %c0_i32_1 = arith.constant 0 : i32
    return %c0_i32, %c0_i32_0 : i32, i32
  }
  func.func @transform_2(%arg0: i32) -> (i32, i32) {
    %c0_i32 = arith.constant 0 : i32
    %c0_i32_0 = arith.constant 0 : i32
    %c0_i32_1 = arith.constant 0 : i32
    return %c0_i32, %c0_i32_0 : i32, i32
  }
  func.func @transform_3(%arg0: i32) -> (i32, i32) {
    %c0_i32 = arith.constant 0 : i32
    %c0_i32_0 = arith.constant 0 : i32
    %c0_i32_1 = arith.constant 0 : i32
    return %c0_i32, %c0_i32_0 : i32, i32
  }
  func.func @transform_4(%arg0: i32) -> (i32, i32) {
    %c0_i32 = arith.constant 0 : i32
    %c0_i32_0 = arith.constant 0 : i32
    %c0_i32_1 = arith.constant 0 : i32
    return %c0_i32, %c0_i32_0 : i32, i32
  }
  func.func @transform_5(%arg0: i32) -> (i32, i32) {
    %c0_i32 = arith.constant 0 : i32
    %c0_i32_0 = arith.constant 0 : i32
    %c0_i32_1 = arith.constant 0 : i32
    return %c0_i32, %c0_i32_0 : i32, i32
  }
  func.func @transform_6(%arg0: i32) -> (i32, i32) {
    %c0_i32 = arith.constant 0 : i32
    %c0_i32_0 = arith.constant 0 : i32
    %c0_i32_1 = arith.constant 0 : i32
    return %c0_i32, %c0_i32_0 : i32, i32
  }
  func.func @transform_7(%arg0: i32) -> (i32, i32) {
    %c0_i32 = arith.constant 0 : i32
    %c0_i32_0 = arith.constant 0 : i32
    return %arg0, %c0_i32 : i32, i32
  }
}

</mosaic_0001>

<bundles_post_ra>
// kernel: tpu_custom_call.1
= control target key start
LH: loop header
LB: loop body
LE: loop exit
PB: predicated region body
PF: predicated region fallthrough
CT: control target
= control target key end

     0   :  { %12 = vsyncpa [#allocation3], 0  ;;  %s805_s0 = inlined_call_operand.hbm [shape: f32[8,128], index: 0, kind: input, shape index: {}]   ;;  %s806_s1 = inlined_call_operand.hbm [shape: bf16[128,128], index: 1, kind: input, shape index: {}]   ;;  %s807_s2 = inlined_call_operand.hbm [shape: bf16[128,128], index: 2, kind: input, shape index: {}]   ;;  %s808_s3 = inlined_call_operand.hbm [shape: bf16[128,128], index: 3, kind: input, shape index: {}]   ;;  %s809_s4 = inlined_call_operand.vmem [shape: f32[1,128], index: 4, kind: input, shape index: {}]   ;;  %s810_s5 = inlined_call_operand.vmem [shape: f32[1,128], index: 5, kind: input, shape index: {}]   ;;  %s811_s6 = inlined_call_operand.vmem [shape: f32[1,128], index: 6, kind: input, shape index: {}]   ;;  %s812_s7 = inlined_call_operand.hbm [shape: f32[8,128], index: 7, kind: output, shape index: {}]  }
   0x1   :  { %13 = vsyncpa [#allocation6], 0 }
   0x2   :  { %14 = vsyncpa [#allocation9], 0 }
   0x3   :  { %15 = vsyncpa [#allocation4], 0  ;;  %s693_s24 = smov [#allocation5]  }
   0x4   :  { %s31_s25 = sshll.u32 %s693_s24, 4  ;;  %s32_s25 = int_to_ptr.vmem [resolvable:$true] %s31_s25 }
   0x5   :  { %s593_s26 = scalar_lea.vmem %s32_s25, 1024  ;;  %p598_p1 = scmp.lt.s32.totalorder %s32_s25, %s32_s25 }
   0x6   :  { %p594_p0 = scmp.ne.s32.totalorder %s32_s25, %s593_s26  ;;  %p599_p2 = scmp.lt.s32.totalorder %s593_s26, %s593_s26 }
   0x8   :  { %p600_p3 = por %p599_p2, %p598_p1 }
   0xa   :  { %p601_p4 = pnand %p600_p3, %p594_p0 }
   0xc   :  { %604 = shalt.err (!%p601_p4)
}
   0xd   :  { %s694_s27 = smov 64   ;;  %s695_s28 = smov 4  }
   0xe   :  { %37 = dma.hbm_to_vmem [thread:$0]  %s806_s1, 1024, %s32_s25, [#allocation6], %s694_s27, %s694_s27, %s695_s28  }
   0xf   :  { %s696_s8 = smov [#allocation2]   ;;  %s697_s10 = smov [#allocation7]  }
  0x10   :  { %s22_s9 = sshll.u32 %s696_s8, 4  ;;  %s43_s11 = sshll.u32 %s697_s10, 4  ;;  %s23_s9 = int_to_ptr.vmem [resolvable:$true] %s22_s9  ;;  %s44_s11 = int_to_ptr.vmem [resolvable:$true] %s43_s11 }
  0x11   :  { %s613_s12 = scalar_lea.vmem %s23_s9, 128  ;;  %p618_p6 = scmp.lt.s32.totalorder %s23_s9, %s23_s9 }
  0x12   :  { %p614_p5 = scmp.ne.s32.totalorder %s23_s9, %s613_s12  ;;  %p619_p7 = scmp.lt.s32.totalorder %s613_s12, %s613_s12 }
  0x14   :  { %p620_p8 = por %p619_p7, %p618_p6 }
  0x16   :  { %p621_p9 = pnand %p620_p8, %p614_p5 }
  0x18   :  { %624 = shalt.err (!%p621_p9)
}
  0x19   :  { %25 = dma.hbm_to_vmem [thread:$0]  %s805_s0, 128, %s23_s9, [#allocation3]  }
  0x1a   :  { %s633_s15 = scalar_lea.vmem %s44_s11, 1024  ;;  %p638_p11 = scmp.lt.s32.totalorder %s44_s11, %s44_s11 }
  0x1b   :  { %p634_p10 = scmp.ne.s32.totalorder %s44_s11, %s633_s15  ;;  %p639_p12 = scmp.lt.s32.totalorder %s633_s15, %s633_s15 }
  0x1d   :  { %p640_p13 = por %p639_p12, %p638_p11 }
  0x1f   :  { %p641_p0 = pnand %p640_p13, %p634_p10 }
  0x21   :  { %644 = shalt.err (!%p641_p0)
}
  0x22   :  { %49 = dma.hbm_to_vmem [thread:$0]  %s807_s2, 1024, %s44_s11, [#allocation6], %s694_s27, %s694_s27, %s695_s28  }
  0x23   :  { %s698_s17 = smov [#allocation8]  }
  0x24   :  { %s55_s18 = sshll.u32 %s698_s17, 4  ;;  %s56_s18 = int_to_ptr.vmem [resolvable:$true] %s55_s18 }
  0x25   :  { %s653_s19 = scalar_lea.vmem %s56_s18, 1024  ;;  %p658_p2 = scmp.lt.s32.totalorder %s56_s18, %s56_s18 }
  0x26   :  { %p654_p1 = scmp.ne.s32.totalorder %s56_s18, %s653_s19  ;;  %p659_p3 = scmp.lt.s32.totalorder %s653_s19, %s653_s19 }
  0x28   :  { %p660_p4 = por %p659_p3, %p658_p2 }
  0x2a   :  { %p661_p5 = pnand %p660_p4, %p654_p1 }
  0x2c   :  { %664 = shalt.err (!%p661_p5)
}
  0x2d   :  { %61 = dma.hbm_to_vmem [thread:$0]  %s808_s3, 1024, %s56_s18, [#allocation9], %s694_s27, %s694_s27, %s695_s28  }
  0x2e   :  { %685 = dma.done.wait [#allocation3], 128  }
  0x2f   :  { %686 = vsyncadd [#allocation3], 4294967168 }
  0x30   :  { %687 = dma.done.wait [#allocation6], 2048  }
  0x31   :  { %688 = vsyncadd [#allocation6], 4294965248 }
  0x32   :  { %689 = dma.done.wait [#allocation9], 1024  }
  0x33   :  { %690 = vsyncadd [#allocation9], 4294966272  ;;  %v699_v0 = vmov 0.0   ;;  %vm700_vm0 = vmmov 0   ;;  %v561_v1 = vld [vmem:[#allocation5 + $0x38] sm:$0xff]   ;;  %v562_v2 = vld [vmem:[#allocation5 + $0x30] sm:$0xff]  }
  0x34   :  { %492 = vmatprep.subr.bf16.mxu0 %v699_v0  ;;  %508 = vmatprep.mubr.msk.bf16.mxu0 %vm700_vm0, %v699_v0  ;;  %v563_v3 = vld [vmem:[#allocation5 + $0x28] sm:$0xff]   ;;  %v569_v4 = vld [vmem:[#allocation7 + $0x38] sm:$0xff]   ;;  %v564_v5 = vld [vmem:[#allocation5 + $0x20] sm:$0xff]   ;;  %s701_s24 = smov [#allocation10]  }
  0x35   :  { %512 = vmatprep.subr.bf16.mxu1 %v699_v0  ;;  %528 = vmatprep.mubr.msk.bf16.mxu1 %vm700_vm0, %v699_v0  ;;  %v570_v6 = vld [vmem:[#allocation7 + $0x30] sm:$0xff]   ;;  %v565_v7 = vld [vmem:[#allocation5 + $0x18] sm:$0xff]   ;;  %v571_v8 = vld [vmem:[#allocation7 + $0x28] sm:$0xff]   ;;  %s427_s25 = sshll.u32 %s701_s24, 4  ;;  %s428_s25 = int_to_ptr.vmem [resolvable:$true] %s427_s25 }
  0x36   :  { %493 = vmatpush3.bf16.msra.mxu0 %v561_v1  ;;  %513 = vmatpush3.bf16.msra.mxu1 %v569_v4  ;;  %v566_v9 = vld [vmem:[#allocation5 + $0x10] sm:$0xff]   ;;  %v572_v10 = vld [vmem:[#allocation7 + $0x20] sm:$0xff]   ;;  %v567_v11 = vld [vmem:[#allocation5 + $0x8] sm:$0xff]   ;;  %p670_p7 = scmp.lt.s32.totalorder %s428_s25, %s428_s25 }
  0x37   :  { %494 = vmatprep.subr.bf16.mxu0 %v699_v0  ;;  %514 = vmatprep.subr.bf16.mxu1 %v699_v0  ;;  %v573_v12 = vld [vmem:[#allocation7 + $0x18] sm:$0xff]   ;;  %v568_v13 = vld [vmem:[#allocation5] sm:$0xff]   ;;  %v574_v15 = vld [vmem:[#allocation7 + $0x10] sm:$0xff]  }
  0x38   :  { %v81_v14 = vld [vmem:[#allocation2] sm:$0xff]  ;;  %v575_v17 = vld [vmem:[#allocation7 + $0x8] sm:$0xff]   ;;  %v576_v18 = vld [vmem:[#allocation7] sm:$0xff]  }
  0x39   :  { %v98_v16 = vpack.c.bf16 %v81_v14, %v81_v14  ;;  %v577_v19 = vld [vmem:[#allocation8 + $0x38] sm:$0xff]   ;;  %v578_v20 = vld [vmem:[#allocation8 + $0x30] sm:$0xff]   ;;  %v579_v21 = vld [vmem:[#allocation8 + $0x28] sm:$0xff]  }
  0x3a   :  { %495 = vmatpush3.bf16.msra.mxu0 %v562_v2  ;;  %515 = vmatpush3.bf16.msra.mxu1 %v570_v6  ;;  %v580_v22 = vld [vmem:[#allocation8 + $0x20] sm:$0xff]   ;;  %v581_v23 = vld [vmem:[#allocation8 + $0x18] sm:$0xff]   ;;  %v582_v24 = vld [vmem:[#allocation8 + $0x10] sm:$0xff]  }
  0x3b   :  { %496 = vmatprep.subr.bf16.mxu0 %v699_v0  ;;  %516 = vmatprep.subr.bf16.mxu1 %v699_v0  ;;  %v438_v25 = vld [vmem:[%s809_s4] ss:$0 sm:$0xff]  ;;  %v583_v33 = vld [vmem:[#allocation8 + $0x8] sm:$0xff]   ;;  %v584_v34 = vld [vmem:[#allocation8] sm:$0xff]  }
  0x3c   :  { %v447_v35 = vld [vmem:[%s810_s5] ss:$0 sm:$0xff]  ;;  %s665_s5 = scalar_lea.vmem %s428_s25, 128 }
  0x3d   :  { %v456_v43 = vld [vmem:[%s811_s6] ss:$0 sm:$0xff]  ;;  %p666_p6 = scmp.ne.s32.totalorder %s428_s25, %s665_s5  ;;  %p671_p8 = scmp.lt.s32.totalorder %s665_s5, %s665_s5 }
  0x3e   :  { %497 = vmatpush3.bf16.msra.mxu0 %v563_v3  ;;  %517 = vmatpush3.bf16.msra.mxu1 %v571_v8 }
  0x3f   :  { %498 = vmatprep.subr.bf16.mxu0 %v699_v0  ;;  %518 = vmatprep.subr.bf16.mxu1 %v699_v0  ;;  %p672_p9 = por %p671_p8, %p670_p7 }
  0x41   :  { %p673_p10 = pnand %p672_p9, %p666_p6 }
  0x42   :  { %499 = vmatpush3.bf16.msra.mxu0 %v564_v5  ;;  %519 = vmatpush3.bf16.msra.mxu1 %v572_v10 }
  0x43   :  { %500 = vmatprep.subr.bf16.mxu0 %v699_v0  ;;  %520 = vmatprep.subr.bf16.mxu1 %v699_v0 }
  0x46   :  { %501 = vmatpush3.bf16.msra.mxu0 %v565_v7  ;;  %521 = vmatpush3.bf16.msra.mxu1 %v573_v12 }
  0x47   :  { %502 = vmatprep.subr.bf16.mxu0 %v699_v0  ;;  %522 = vmatprep.subr.bf16.mxu1 %v699_v0 }
  0x4a   :  { %503 = vmatpush3.bf16.msra.mxu0 %v566_v9  ;;  %523 = vmatpush3.bf16.msra.mxu1 %v574_v15 }
  0x4b   :  { %504 = vmatprep.subr.bf16.mxu0 %v699_v0  ;;  %524 = vmatprep.subr.bf16.mxu1 %v699_v0 }
  0x4e   :  { %505 = vmatpush3.bf16.msra.mxu0 %v567_v11  ;;  %525 = vmatpush3.bf16.msra.mxu1 %v575_v17 }
  0x4f   :  { %506 = vmatprep.subr.bf16.mxu0 %v699_v0  ;;  %526 = vmatprep.subr.bf16.mxu1 %v699_v0 }
  0x52   :  { %507 = vmatpush3.bf16.msra.mxu0 %v568_v13  ;;  %527 = vmatpush3.bf16.msra.mxu1 %v576_v18 }
  0x53   :  { %532 = vmatprep.subr.bf16.mxu0 %v699_v0 }
  0x55   :  { %509 = vmatmul.mubr.bf16.vlgmr.msra.gmra.mxu0 %v98_v16 }
  0x56   :  { %548 = vmatprep.mubr.msk.bf16.mxu0 %vm700_vm0, %v699_v0  ;;  %533 = vmatpush3.bf16.msra.mxu0 %v577_v19 }
  0x57   :  { %534 = vmatprep.subr.bf16.mxu0 %v699_v0 }
  0x5a   :  { %535 = vmatpush3.bf16.msra.mxu0 %v578_v20 }
  0x5b   :  { %536 = vmatprep.subr.bf16.mxu0 %v699_v0 }
  0x5e   :  { %537 = vmatpush3.bf16.msra.mxu0 %v579_v21 }
  0x5f   :  { %538 = vmatprep.subr.bf16.mxu0 %v699_v0 }
  0x62   :  { %539 = vmatpush3.bf16.msra.mxu0 %v580_v22 }
  0x63   :  { %540 = vmatprep.subr.bf16.mxu0 %v699_v0 }
  0x66   :  { %541 = vmatpush3.bf16.msra.mxu0 %v581_v23 }
  0x67   :  { %542 = vmatprep.subr.bf16.mxu0 %v699_v0 }
  0x6a   :  { %543 = vmatpush3.bf16.msra.mxu0 %v582_v24 }
  0x6b   :  { %544 = vmatprep.subr.bf16.mxu0 %v699_v0 }
  0x6e   :  { %545 = vmatpush3.bf16.msra.mxu0 %v583_v33 }
  0x6f   :  { %546 = vmatprep.subr.bf16.mxu0 %v699_v0 }
  0x72   :  { %547 = vmatpush3.bf16.msra.mxu0 %v584_v34 }
 0x115   :  { %v188_v26 = vpop.f32.mrf.mxu0 }
 0x116   :  { %v189_v27 = vadd.f32 %v438_v25, %v188_v26 }
 0x117   :  { %v510_v28 = vpop.f32.mrf.mxu0 }
 0x118   :  { %v194_v29 = vmax.f32 %v189_v27, 0.0 }
 0x119   :  { %v191_v30 = vpop.f32.mrf.mxu0 }
 0x11a   :  { %v211_v31 = vpack.c.bf16 %v194_v29, %v194_v29 }
 0x11b   :  { %v511_v32 = vpop.f32.mrf.mxu0 }
 0x11c   :  { %529 = vmatmul.mubr.bf16.vlgmr.msra.gmra.mxu1 %v211_v31 }
 0x1dc   :  { %v301_v36 = vpop.f32.mrf.mxu1 }
 0x1dd   :  { %v302_v37 = vadd.f32 %v447_v35, %v301_v36 }
 0x1de   :  { %v530_v38 = vpop.f32.mrf.mxu1 }
 0x1df   :  { %v307_v39 = vmax.f32 %v302_v37, 0.0 }
 0x1e0   :  { %v304_v40 = vpop.f32.mrf.mxu1 }
 0x1e1   :  { %v324_v41 = vpack.c.bf16 %v307_v39, %v307_v39 }
 0x1e2   :  { %v531_v42 = vpop.f32.mrf.mxu1 }
 0x1e3   :  { %549 = vmatmul.mubr.bf16.vlgmr.msra.gmra.mxu0 %v324_v41 }
 0x2a3   :  { %v414_v44 = vpop.f32.mrf.mxu0 }
 0x2a4   :  { %v415_v45 = vadd.f32 %v456_v43, %v414_v44 }
 0x2a5   :  { %v550_v46 = vpop.f32.mrf.mxu0 }
 0x2a6   :  { %420 = vst [vmem:[#allocation10] sm:$0xff] %v415_v45 }
 0x2a7   :  { %v417_v47 = vpop.f32.mrf.mxu0 }
 0x2a8   :  { %676 = shalt.err (!%p673_p10)
}
 0x2a9   :  { %430 = dma.vmem_to_hbm [thread:$0]  %s428_s25, 128, %s812_s7, [#allocation4]   ;;  %v551_v48 = vpop.f32.mrf.mxu0 }
 0x2aa   :  { %691 = dma.done.wait [#allocation4], 128  }
 0x2ab   :  { %692 = vsyncadd [#allocation4], 4294967168 }
 0x2ac   :  { %434 = vsyncpa [#allocation3], 1 }
 0x2ad   :  { %435 = vsyncpa [#allocation6], 1 }
 0x2ae   :  { %436 = vsyncpa [#allocation9], 1 }
 0x2af   :  { %437 = vsyncpa [#allocation4], 1 }

</bundles_post_ra>
